<compile_context>
chip_gen: v7x
topology: tpu7x:2x2x1
jax: 0.10.0
libtpu: 0.0.40
codegen_flags: <defaults>
</compile_context>

<pallas_src>
import functools

import numpy as np
import jax
import jax.numpy as jnp
from jax.experimental import pallas as pl
from jax.experimental.pallas import tpu as pltpu


def _round_up(a, m):
    return -(-a // m) * m


def _int_pow(x, k):
    """x**k for a small non-negative integer k via explicit VPU multiplies."""
    if k <= 0:
        return jnp.ones_like(x)
    r = x
    for _ in range(k - 1):
        r = r * x
    return r


def _head_kernel(x_ref, w_ref, b_ref, o_ref, *, pooling, p, eps, reduce_axis):
    """x_ref: (TN, C, HW) [reduce_axis=2] or (TN, HW, C) [reduce_axis=1];
    w_ref: (C, E_pad); b_ref: (1, E_pad); o_ref: (TN, E_pad)."""
    if pooling == "max":
        # max is exact in the input dtype; cast only the tiny pooled result.
        pooled = jnp.max(x_ref[...], axis=reduce_axis).astype(jnp.float32)
    elif pooling == "avg":
        pooled = jnp.mean(x_ref[...].astype(jnp.float32), axis=reduce_axis)
    elif pooling == "gem":
        # GeM: adaptive_avg_pool2d(clamp(x, eps)^p, 1)^(1/p)
        xc = jnp.maximum(x_ref[...].astype(jnp.float32), eps)
        p_int = int(np.floor(p + 1e-9))
        frac = p - p_int
        if abs(frac) < 1e-9 and 1 <= p_int <= 8:
            xp = _int_pow(xc, p_int)                       # VPU multiplies only
        elif abs(frac - 0.5) < 1e-9 and 0 <= p_int <= 8:
            xp = _int_pow(xc, p_int) * jnp.sqrt(xc)        # e.g. x^2.5 = x*x*sqrt(x)
        else:
            xp = xc ** p                                   # rare: exp/log on EUP
        pooled = jnp.mean(xp, axis=reduce_axis)            # (TN, C) f32
        pooled = pooled ** (1.0 / p)                       # fractional pow on tiny result
    else:
        raise ValueError(f"unknown pooling {pooling}")

    # last_linear (weight resident in VMEM across the whole batch grid).
    feat = jnp.dot(pooled, w_ref[...],
                   preferred_element_type=jnp.float32) + b_ref[...]   # (TN, E_pad)

    # torch.nn.functional.normalize(x, p=2, dim=1, eps=1e-12)
    # (padded E columns are exactly zero, so they don't affect the norm).
    sq = jnp.sum(feat * feat, axis=-1, keepdims=True)
    inv = jax.lax.rsqrt(jnp.maximum(sq, 1e-24))
    o_ref[...] = (feat * inv).astype(o_ref.dtype)


def _default_vmem_budget():
    """Tile budget for in-flight feature tiles, per TPU generation."""
    kind = ""
    try:
        kind = jax.devices()[0].device_kind.lower()
    except Exception:
        pass
    if ("v5" in kind) or ("v6" in kind):   # 128 MiB physical VMEM per core
        return 80 << 20
    return 34 << 20                        # v7x (64 MiB) and unknown: stay safe


def model_head(features, weight, bias, *, pooling="avg", p=3.0, eps=1e-6,
               layout="NCHW", batch_tile=None, vmem_budget_bytes=None):
    """Head of `Model.forward`: pooling -> flatten -> last_linear -> L2 normalize.

    features: (N, C, H, W) if layout="NCHW", (N, H, W, C) if layout="NHWC".
    weight:   (E, C) torch-style last_linear weight.   bias: (E,).
    """
    if layout == "NCHW":
        n, c, h, w = features.shape
        hw = h * w
        x3 = features.reshape(n, c, hw)          # free reshape; HW on lanes
        sub_dim, lane_dim = c, hw
        reduce_axis = 2
    elif layout == "NHWC":
        n, h, w, c = features.shape
        hw = h * w
        x3 = features.reshape(n, hw, c)          # free reshape; C on lanes
        sub_dim, lane_dim = hw, c
        reduce_axis = 1
    else:
        raise ValueError(f"unknown layout {layout}")

    e = weight.shape[0]
    e_pad = _round_up(e, 128)                    # lane-dense output, unmasked stores
    w_ce = jnp.transpose(weight, (1, 0)).astype(jnp.float32)        # (C, E), tiny
    b_f32 = bias.astype(jnp.float32)
    if e_pad != e:
        w_ce = jnp.pad(w_ce, ((0, 0), (0, e_pad - e)))
        b_f32 = jnp.pad(b_f32, (0, e_pad - e))
    b_1e = b_f32.reshape(1, e_pad)

    itemsize = jnp.dtype(x3.dtype).itemsize
    sublane_mult = {1: 32, 2: 16, 4: 8}.get(itemsize, 8)
    # Padded VMEM footprint of one batch row of the feature tile.
    row_in = _round_up(sub_dim, sublane_mult) * _round_up(lane_dim, 128) * itemsize
    # Possible f32 working copy if the upcast materializes (bf16/int8 inputs).
    row_work = 0
    if itemsize < 4 and pooling != "max":
        row_work = _round_up(sub_dim, 8) * _round_up(lane_dim, 128) * 4
    row_out = 2 * e_pad * 4                       # double-buffered f32 output row
    per_row = 2 * row_in + row_work + row_out     # 2x: double-buffered input DMA

    fixed = (2 * _round_up(c, 8) * e_pad * 4      # (double-buffered) resident weight
             + 2 * 8 * e_pad * 4)                 # bias
    headroom = 4 << 20

    if vmem_budget_bytes is None:
        vmem_budget_bytes = _default_vmem_budget()

    n8 = _round_up(n, 8)
    if batch_tile is None:
        tn = max(vmem_budget_bytes - fixed - headroom, per_row) // per_row
        tn = max(8, (tn // 8) * 8)
        # Keep >= ~4 grid steps when the batch allows it (megacore + DMA overlap).
        tn_cap = max(8, _round_up(-(-n8 // 4), 8))
        tn = min(tn, tn_cap, n8)
        if n < 8:
            tn = n                                # block dim == full array dim
    else:
        tn = int(batch_tile)

    grid = (pl.cdiv(n, tn),)                      # ragged last block, no input pad

    footprint = tn * per_row + fixed + headroom
    vmem_limit = int(min(max(32 << 20, footprint), 100 << 20))

    kernel = functools.partial(_head_kernel, pooling=pooling, p=float(p),
                               eps=float(eps), reduce_axis=reduce_axis)
    block_in = (tn,) + tuple(x3.shape[1:])

    out = pl.pallas_call(
        kernel,
        out_shape=jax.ShapeDtypeStruct((n, e_pad), jnp.float32),
        grid=grid,
        in_specs=[
            pl.BlockSpec(block_in, lambda i: (i, 0, 0)),      # feature tile (streamed)
            pl.BlockSpec((c, e_pad), lambda i: (0, 0)),       # weight, resident
            pl.BlockSpec((1, e_pad), lambda i: (0, 0)),       # bias, resident
        ],
        out_specs=pl.BlockSpec((tn, e_pad), lambda i: (i, 0)),
        compiler_params=pltpu.CompilerParams(
            dimension_semantics=("parallel",),
            vmem_limit_bytes=vmem_limit,
        ),
    )(x3, w_ce, b_1e)

    return out[:, :e] if e_pad != e else out


def _reference(features, weight, bias, pooling, p, eps, layout="NCHW"):
    if layout == "NHWC":
        features = jnp.transpose(features, (0, 3, 1, 2))
    n, c, h, w = features.shape
    x = features.astype(jnp.float32).reshape(n, c, h * w)
    if pooling == "avg":
        pooled = jnp.mean(x, axis=-1)
    elif pooling == "max":
        pooled = jnp.max(x, axis=-1)
    else:
        pooled = jnp.mean(jnp.maximum(x, eps) ** p, axis=-1) ** (1.0 / p)
    feat = pooled @ weight.T + bias
    norm = jnp.sqrt(jnp.sum(feat * feat, axis=-1, keepdims=True))
    return feat / jnp.maximum(norm, 1e-12)


if __name__ == "__main__":
    key = jax.random.PRNGKey(0)
    k_x, k_w, k_b, k_x2 = jax.random.split(key, 4)

    # Small head-sized shapes: batch=2, channels=32, spatial 16x16, embedding=64.
    N, C, H, W, E = 2, 32, 16, 16, 64
    x = jax.random.normal(k_x, (N, C, H, W), dtype=jnp.float32)
    limit = (6.0 / (C + E)) ** 0.5                 # xavier-uniform-like init
    weight = jax.random.uniform(k_w, (E, C), jnp.float32, -limit, limit)
    bias = jax.random.uniform(k_b, (E,), jnp.float32, -0.1, 0.1)

    ok = True
    cases = [("avg", 3.0), ("max", 3.0), ("gem", 3.0), ("gem", 2.0), ("gem", 2.5)]
    for pooling, p in cases:
        out = jax.block_until_ready(
            model_head(x, weight, bias, pooling=pooling, p=p, eps=1e-6))
        ref = _reference(x, weight, bias, pooling, p, 1e-6)
        if not jnp.allclose(out, ref, atol=1e-4, rtol=1e-4):
            ok = False
            print(f"MISMATCH pooling={pooling} p={p} layout=NCHW")

    # NHWC path (channels on lanes — preferred for 7x7 maps) with a ragged batch
    # (N not a multiple of the tile) to exercise the no-pad last block.
    N2, H2, W2 = 10, 7, 7
    x2 = jax.random.normal(k_x2, (N2, H2, W2, C), dtype=jnp.float32)
    for pooling, p in [("avg", 3.0), ("gem", 3.0)]:
        out = jax.block_until_ready(
            model_head(x2, weight, bias, pooling=pooling, p=p, eps=1e-6,
                       layout="NHWC", batch_tile=8))
        ref = _reference(x2, weight, bias, pooling, p, 1e-6, layout="NHWC")
        if not jnp.allclose(out, ref, atol=1e-4, rtol=1e-4):
            ok = False
            print(f"MISMATCH pooling={pooling} p={p} layout=NHWC")

    if ok:
        print("KERNEL_OK")
</pallas_src>

<mosaic_0001>
module attributes {stable_mosaic.version = 11 : i64} {
  func.func @_head_kernel(%arg0: i32, %arg1: memref<2x32x256xf32, #tpu.memory_space<vmem>>, %arg2: memref<32x128xf32, #tpu.memory_space<vmem>>, %arg3: memref<1x128xf32, #tpu.memory_space<vmem>>, %arg4: memref<2x128xf32, #tpu.memory_space<vmem>>) attributes {dimension_semantics = [#tpu.dimension_semantics<parallel>], iteration_bounds = array<i64: 1>, scalar_prefetch = 0 : i64, scratch_operands = 0 : i64, tpu.core_type = #tpu.core_type<tc>, window_params = [{transform_indices = @transform_0, window_bounds = array<i64: 2, 32, 256>}, {pipeline_mode = #tpu.pipeline_mode<synchronous>, transform_indices = @transform_1, window_bounds = array<i64: 32, 128>}, {pipeline_mode = #tpu.pipeline_mode<synchronous>, transform_indices = @transform_2, window_bounds = array<i64: 1, 128>}, {transform_indices = @transform_3, window_bounds = array<i64: 2, 128>}]} {
    %c0 = arith.constant 0 : index
    %c0_0 = arith.constant 0 : index
    %c0_1 = arith.constant 0 : index
    %0 = vector.load %arg1[%c0, %c0_0, %c0_1] : memref<2x32x256xf32, #tpu.memory_space<vmem>>, vector<2x32x256xf32>
    %cst = arith.constant dense<0.000000e+00> : vector<2x32xf32>
    %1 = vector.multi_reduction <add>, %0, %cst [2] : vector<2x32x256xf32> to vector<2x32xf32>
    %cst_2 = arith.constant 2.560000e+02 : f32
    %2 = vector.broadcast %cst_2 : f32 to vector<2x32xf32>
    %3 = arith.divf %1, %2 : vector<2x32xf32>
    %c0_3 = arith.constant 0 : index
    %c0_4 = arith.constant 0 : index
    %4 = vector.load %arg2[%c0_3, %c0_4] : memref<32x128xf32, #tpu.memory_space<vmem>>, vector<32x128xf32>
    %cst_5 = arith.constant dense<0.000000e+00> : vector<2x128xf32>
    %5 = tpu.matmul %3, %4, %cst_5 {dimension_numbers = #tpu.dot_dimension_numbers<[1], [0], [0], [1], [0, 0, 1, 1], [], []>} : vector<2x32xf32>, vector<32x128xf32>, vector<2x128xf32> -> vector<2x128xf32>
    %c0_6 = arith.constant 0 : index
    %c0_7 = arith.constant 0 : index
    %6 = vector.load %arg3[%c0_6, %c0_7] : memref<1x128xf32, #tpu.memory_space<vmem>>, vector<1x128xf32>
    %7 = vector.broadcast %6 : vector<1x128xf32> to vector<2x128xf32>
    %8 = arith.addf %5, %7 : vector<2x128xf32>
    %9 = arith.mulf %8, %8 : vector<2x128xf32>
    %cst_8 = arith.constant dense<0.000000e+00> : vector<2xf32>
    %10 = vector.multi_reduction <add>, %9, %cst_8 [1] : vector<2x128xf32> to vector<2xf32>
    %11 = vector.shape_cast %10 : vector<2xf32> to vector<2x1xf32>
    %cst_9 = arith.constant 1.000000e-24 : f32
    %12 = vector.broadcast %cst_9 : f32 to vector<2x1xf32>
    %13 = arith.maximumf %11, %12 : vector<2x1xf32>
    %14 = math.rsqrt %13 : vector<2x1xf32>
    %15 = vector.broadcast %14 : vector<2x1xf32> to vector<2x128xf32>
    %16 = arith.mulf %8, %15 : vector<2x128xf32>
    %c0_10 = arith.constant 0 : index
    %c0_11 = arith.constant 0 : index
    %17 = vector.load %arg4[%c0_10, %c0_11] : memref<2x128xf32, #tpu.memory_space<vmem>>, vector<2x128xf32>
    tpu.vector_store %arg4[%c0_10, %c0_11], %16 {strides = array<i32>} : memref<2x128xf32, #tpu.memory_space<vmem>>, vector<2x128xf32>,
    return
  }
  func.func @transform_0(%arg0: i32) -> (i32, i32, i32) {
    %c0_i32 = arith.constant 0 : i32
    %c0_i32_0 = arith.constant 0 : i32
    %c0_i32_1 = arith.constant 0 : i32
    return %arg0, %c0_i32, %c0_i32_0 : i32, i32, i32
  }
  func.func @transform_1(%arg0: i32) -> (i32, i32) {
    %c0_i32 = arith.constant 0 : i32
    %c0_i32_0 = arith.constant 0 : i32
    %c0_i32_1 = arith.constant 0 : i32
    return %c0_i32, %c0_i32_0 : i32, i32
  }
  func.func @transform_2(%arg0: i32) -> (i32, i32) {
    %c0_i32 = arith.constant 0 : i32
    %c0_i32_0 = arith.constant 0 : i32
    %c0_i32_1 = arith.constant 0 : i32
    return %c0_i32, %c0_i32_0 : i32, i32
  }
  func.func @transform_3(%arg0: i32) -> (i32, i32) {
    %c0_i32 = arith.constant 0 : i32
    %c0_i32_0 = arith.constant 0 : i32
    return %arg0, %c0_i32 : i32, i32
  }
}

</mosaic_0001>

<bundles_post_ra>
// kernel: tpu_custom_call.1
= control target key start
LH: loop header
LB: loop body
LE: loop exit
PB: predicated region body
PF: predicated region fallthrough
CT: control target
= control target key end

     0   :  { %8 = vsyncpa [#allocation3], 0  ;;  %s434_s0 = inlined_call_operand.hbm [shape: f32[2,32,256], index: 0, kind: input, shape index: {}]   ;;  %s435_s1 = inlined_call_operand.hbm [shape: f32[32,128], index: 1, kind: input, shape index: {}]   ;;  %s436_s2 = inlined_call_operand.vmem [shape: f32[1,128], index: 2, kind: input, shape index: {}]   ;;  %s437_s3 = inlined_call_operand.hbm [shape: f32[2,128], index: 3, kind: output, shape index: {}]  }
   0x1   :  { %9 = vsyncpa [#allocation6], 0 }
   0x2   :  { %10 = vsyncpa [#allocation4], 0  ;;  %s365_s12 = smov [#allocation2]   ;;  %s293_s16 = scalar_lea.hbm %s434_s0, 2048 }
   0x3   :  { %s16_s13 = sshll.u32 %s365_s12, 4  ;;  %p294_p0 = scmp.ne.s32.totalorder %s434_s0, %s293_s16  ;;  %s17_s13 = int_to_ptr.vmem [resolvable:$true] %s16_s13 }
   0x4   :  { %p297_p1 = scmp.lt.u32.totalorder %s293_s16, %s434_s0 }
   0x6   :  { %p299_p2 = pnand %p297_p1, %p294_p0 }
   0x8   :  { %302 = shalt.err (!%p299_p2)
}
   0x9   :  { %s303_s21 = scalar_lea.vmem %s17_s13, 2048  ;;  %p308_p4 = scmp.lt.s32.totalorder %s17_s13, %s17_s13 }
   0xa   :  { %p304_p3 = scmp.ne.s32.totalorder %s17_s13, %s303_s21  ;;  %p309_p5 = scmp.lt.s32.totalorder %s303_s21, %s303_s21 }
   0xc   :  { %p310_p6 = por %p309_p5, %p308_p4 }
   0xe   :  { %p311_p7 = pnand %p310_p6, %p304_p3 }
  0x10   :  { %314 = shalt.err (!%p311_p7)
}
  0x11   :  { %s366_s22 = smov 256   ;;  %s367_s23 = smov 16  }
  0x12   :  { %22 = dma.hbm_to_vmem [thread:$0]  %s434_s0, 2048, %s17_s13, [#allocation3], %s366_s22, %s366_s22, %s367_s23  }
  0x13   :  { %s368_s26 = smov [#allocation5]   ;;  %s315_s30 = scalar_lea.hbm %s435_s1, 512 }
  0x14   :  { %s28_s27 = sshll.u32 %s368_s26, 4  ;;  %p316_p8 = scmp.ne.s32.totalorder %s435_s1, %s315_s30  ;;  %s29_s27 = int_to_ptr.vmem [resolvable:$true] %s28_s27 }
  0x15   :  { %p319_p9 = scmp.lt.u32.totalorder %s315_s30, %s435_s1 }
  0x17   :  { %p321_p10 = pnand %p319_p9, %p316_p8 }
  0x19   :  { %324 = shalt.err (!%p321_p10)
}
  0x1a   :  { %s325_s8 = scalar_lea.vmem %s29_s27, 512  ;;  %p330_p12 = scmp.lt.s32.totalorder %s29_s27, %s29_s27 }
  0x1b   :  { %p326_p11 = scmp.ne.s32.totalorder %s29_s27, %s325_s8  ;;  %p331_p13 = scmp.lt.s32.totalorder %s325_s8, %s325_s8 }
  0x1d   :  { %p332_p0 = por %p331_p13, %p330_p12 }
  0x1f   :  { %p333_p1 = pnand %p332_p0, %p326_p11 }
  0x21   :  { %336 = shalt.err (!%p333_p1)
}
  0x22   :  { %s369_s0 = smov 128   ;;  %s370_s9 = smov 8  }
  0x23   :  { %34 = dma.hbm_to_vmem [thread:$0]  %s435_s1, 512, %s29_s27, [#allocation6], %s369_s0, %s369_s0, %s370_s9  }
  0x24   :  { %359 = dma.done.wait [#allocation3], 2048  }
  0x25   :  { %360 = vsyncadd [#allocation3], 4294965248 }
  0x26   :  { %361 = dma.done.wait [#allocation6], 512  }
  0x27   :  { %362 = vsyncadd [#allocation6], 4294966784  ;;  %v51_v0 = vld [vmem:[#allocation2 + $0x40] sm:$0xff]  ;;  %v52_v1 = vld [vmem:[#allocation2 + $0x48] sm:$0xff]  ;;  %v371_v27 = vmov 0.0|0.0   ;;  %vm372_vm0 = vmmov 0   ;;  %v111_v32 = vlaneseq }
  0x28   :  { %v43_v2 = vld [vmem:[#allocation2] sm:$0xff]  ;;  %v71_v3 = vadd.f32 %v52_v1, %v51_v0  ;;  %v44_v4 = vld [vmem:[#allocation2 + $0x8] sm:$0xff]  ;;  %v53_v5 = vld [vmem:[#allocation2 + $0x50] sm:$0xff]  ;;  %275 = vmatprep.subr.bf16.mxu0 %v371_v27  ;;  %v373_v31 = vmov 0.0   ;;  %vm122_vm1 = vcmask 130112   ;;  %vm129_vm2 = vcmask 195712  }
  0x29   :  { %v54_v6 = vld [vmem:[#allocation2 + $0x58] sm:$0xff]  ;;  %v59_v7 = vadd.f32 %v44_v4, %v43_v2  ;;  %v45_v8 = vld [vmem:[#allocation2 + $0x10] sm:$0xff]  ;;  %v55_v12 = vld [vmem:[#allocation2 + $0x60] sm:$0xff]  ;;  %272 = vmatprep.mubr.msk.f32.mxu0 %vm372_vm0, %v373_v31  ;;  %v112_v34 = vand.u32 127, %v111_v32  ;;  %v114_v39 = vshrl.u32 %v111_v32, 7  ;;  %vm136_vm3 = vcmask 261312  }
  0x2a   :  { %v46_v9 = vld [vmem:[#allocation2 + $0x18] sm:$0xff]  ;;  %72 = vadd.xlane.f32.xlu1 %v71_v3  ;;  %v74_v10 = vadd.f32 %v54_v6, %v53_v5  ;;  %v56_v13 = vld [vmem:[#allocation2 + $0x68] sm:$0xff]  ;;  %v47_v14 = vld [vmem:[#allocation2 + $0x20] sm:$0xff]  ;;  %vm157_vm4 = vcmask 1041409   ;;  %vm159_vm5 = vcmask 261120   ;;  %vm233_vm6 = vcmask 1041408  }
  0x2b   :  { %60 = vadd.xlane.f32.xlu0 %v59_v7  ;;  %v62_v11 = vadd.f32 %v46_v9, %v45_v8  ;;  %v48_v15 = vld [vmem:[#allocation2 + $0x28] sm:$0xff]  ;;  %v77_v16 = vadd.f32 %v56_v13, %v55_v12  ;;  %v57_v18 = vld [vmem:[#allocation2 + $0x70] sm:$0xff]  ;;  %v58_v19 = vld [vmem:[#allocation2 + $0x78] sm:$0xff]  ;;  %v117_v36 = vadd.s32 4294967288, %v112_v34  ;;  %v124_v38 = vadd.s32 4294967280, %v112_v34  ;;  %s374_s13 = smov [#allocation7]  }
  0x2c   :  { %v65_v17 = vadd.f32 %v48_v15, %v47_v14  ;;  %v49_v20 = vld [vmem:[#allocation2 + $0x30] sm:$0xff]  ;;  %v50_v21 = vld [vmem:[#allocation2 + $0x38] sm:$0xff]  ;;  %v80_v22 = vadd.f32 %v58_v19, %v57_v18  ;;  %v92_v24 = vld [vmem:[#allocation5] sm:$0xff]  ;;  %v131_v43 = vadd.s32 4294967272, %v112_v34  ;;  %v115_v47 = vsub.s32 %v112_v34, %v114_v39  ;;  %s247_s14 = sshll.u32 %s374_s13, 4  ;;  %s248_s14 = int_to_ptr.vmem [resolvable:$true] %s247_s14 }
  0x2d   :  { %v68_v23 = vadd.f32 %v50_v21, %v49_v20  ;;  %v93_v25 = vld [vmem:[#allocation5 + $0x8] sm:$0xff]  ;;  %v94_v28 = vld [vmem:[#allocation5 + $0x10] sm:$0xff]  ;;  %v95_v29 = vld [vmem:[#allocation5 + $0x18] sm:$0xff]  ;;  %v120_v41 = vsub.s32 %v117_v36, %v114_v39  ;;  %v127_v45 = vsub.s32 %v124_v38, %v114_v39  ;;  %s337_s15 = scalar_lea.vmem %s248_s14, 32  ;;  %p342_p3 = scmp.lt.s32.totalorder %s248_s14, %s248_s14 }
  0x2e   :  { %75 = vadd.xlane.f32.xlu1 %v74_v10  ;;  %v276_v26 = vpack.c.bf16 %v93_v25, %v92_v24  ;;  %v279_v30 = vpack.c.bf16 %v95_v29, %v94_v28  ;;  %v134_v54 = vsub.s32 %v131_v43, %v114_v39  ;;  %v257_v9 = vld [vmem:[%s436_s2] ss:$0 sm:$0xff]  ;;  %p338_p2 = scmp.ne.s32.totalorder %s248_s14, %s337_s15  ;;  %p343_p4 = scmp.lt.s32.totalorder %s337_s15, %s337_s15 }
  0x2f   :  { %63 = vadd.xlane.f32.xlu0 %v62_v11 }
  0x30   :  { %277 = vmatpush3.bf16.msra.mxu0 %v276_v26  ;;  %p344_p5 = por %p343_p4, %p342_p3 }
  0x31   :  { %278 = vmatprep.subr.bf16.mxu0 %v371_v27 }
  0x32   :  { %78 = vadd.xlane.f32.xlu1 %v77_v16  ;;  %p345_p6 = pnand %p344_p5, %p338_p2 }
  0x33   :  { %66 = vadd.xlane.f32.xlu0 %v65_v17 }
  0x34   :  { %280 = vmatpush3.bf16.msra.mxu0 %v279_v30 }
  0x36   :  { %81 = vadd.xlane.f32.xlu1 %v80_v22 }
  0x37   :  { %69 = vadd.xlane.f32.xlu0 %v68_v23 }
  0xb7   :  { %v73_v33 = vpop.xlane.xlu1 %72 }
  0xb8   :  { %v61_v35 = vpop.xlane.xlu0 %60  ;;  %v88_v48 = vmul.f32 0.00390625, %v73_v33 }
  0xb9   :  { %v84_v51 = vmul.f32 0.00390625, %v61_v35 }
  0xba   :  { %v141_v58 = vrot.slane %v88_v48, %v115_v47 }
  0xbb   :  { %v76_v37 = vpop.xlane.xlu1 %75  ;;  %v116_v62 = vrot.slane %v84_v51, %v115_v47 }
  0xbc   :  { %v64_v40 = vpop.xlane.xlu0 %63  ;;  %v89_v42 = vmul.f32 0.00390625, %v76_v37 }
  0xbd   :  { %v85_v44 = vmul.f32 0.00390625, %v64_v40 }
  0xbe   :  { %v145_v53 = vrot.slane %v89_v42, %v120_v41 }
  0xbf   :  { %v79_v46 = vpop.xlane.xlu1 %78  ;;  %v121_v55 = vrot.slane %v85_v44, %v120_v41 }
  0xc0   :  { %v90_v49 = vmul.f32 0.00390625, %v79_v46  ;;  %v67_v50 = vpop.xlane.xlu0 %66  ;;  %v146_v0 = vsel %vm122_vm1, %v145_v53, %v141_v58 }
  0xc1   :  { %v86_v52 = vmul.f32 0.00390625, %v67_v50  ;;  %v123_v2 = vsel %vm122_vm1, %v121_v55, %v116_v62 }
  0xc2   :  { %v150_v56 = vrot.slane %v90_v49, %v127_v45 }
  0xc3   :  { %v82_v57 = vpop.xlane.xlu1 %81  ;;  %v128_v59 = vrot.slane %v86_v52, %v127_v45 }
  0xc4   :  { %v91_v60 = vmul.f32 0.00390625, %v82_v57  ;;  %v70_v61 = vpop.xlane.xlu0 %69  ;;  %v151_v3 = vsel %vm129_vm2, %v150_v56, %v146_v0 }
  0xc5   :  { %v87_v63 = vmul.f32 0.00390625, %v70_v61  ;;  %v130_v5 = vsel %vm129_vm2, %v128_v59, %v123_v2 }
  0xc6   :  { %v155_v1 = vrot.slane %v91_v60, %v134_v54 }
  0xc7   :  { %v135_v4 = vrot.slane %v87_v63, %v134_v54 }
  0xc8   :  { %v156_v6 = vsel %vm136_vm3, %v155_v1, %v151_v3 }
  0xc9   :  { %v137_v7 = vsel %vm136_vm3, %v135_v4, %v130_v5 }
  0xca   :  { %v158_v8 = vsel %vm157_vm4, %v156_v6, %v137_v7 }
  0xcb   :  { %273 = vmatmul.mubr.msk.f32.vlgmr.msra.gmra.mrb[0].mxu0 %vm159_vm5, %v158_v8 }
 0x19e   :  { %v228_v10 = vpop.f32.mrb[0].mxu0 }
 0x19f   :  { %v229_v11 = vadd.f32 %v257_v9, %v228_v10  ;;  %v274_v12 = vpop.f32.mrb[1].mxu0 }
 0x1a1   :  { %v232_v13 = vmul.f32 %v229_v11, %v229_v11 }
 0x1a3   :  { %v234_v14 = vsel %vm233_vm6, %v232_v13, 0.0 }
 0x1a4   :  { %235 = vadd.xlane.f32.xlu0 %v234_v14 }
 0x231   :  { %v236_v15 = vpop.xlane.xlu0 %235 }
 0x232   :  { %v237_v16 = vmax.f32 %v236_v15, 1e-24 }
 0x234   :  { %291 = vrsqrt.f32 %v237_v16 }
 0x23e   :  { %v292_v17 = vpop.eup %291 }
 0x23f   :  { %v239_v18 = vmul.f32 %v292_v17, %v229_v11 }
 0x241   :  { %240 = vst [vmem:[#allocation7] sm:$0x3] %v239_v18 }
 0x242   :  { %348 = shalt.err (!%p345_p6)
}
 0x243   :  { %s349_s17 = scalar_lea.hbm %s437_s3, 32 }
 0x244   :  { %p350_p7 = scmp.ne.s32.totalorder %s437_s3, %s349_s17  ;;  %p353_p8 = scmp.lt.u32.totalorder %s349_s17, %s437_s3 }
 0x246   :  { %p355_p9 = pnand %p353_p8, %p350_p7 }
 0x248   :  { %358 = shalt.err (!%p355_p9)
}
 0x249   :  { %250 = dma.vmem_to_hbm [thread:$0]  %s248_s14, 32, %s437_s3, [#allocation4]  }
 0x24a   :  { %363 = dma.done.wait [#allocation4], 32  }
 0x24b   :  { %364 = vsyncadd [#allocation4], 4294967264 }
 0x24c   :  { %254 = vsyncpa [#allocation3], 1 }
 0x24d   :  { %255 = vsyncpa [#allocation6], 1 }
 0x24e   :  { %256 = vsyncpa [#allocation4], 1 }

</bundles_post_ra>
